<compile_context>
chip_gen: v7x
topology: tpu7x:2x2x1
jax: 0.10.0
libtpu: 0.0.40
codegen_flags: <defaults>
</compile_context>

<pallas_src>
import functools

import jax
import jax.numpy as jnp
from jax import lax
from jax.experimental import pallas as pl
from jax.experimental.pallas import tpu as pltpu

LANE = 128  # pad head dim to full lane width -> lane-dense output stores


def _attention_kernel(x_ref, wqkv_ref, o_ref, *, scale, d_pad):
    # x_ref:    [1, T, d_in]        (one batch element per grid step)
    # wqkv_ref: [d_in, 3 * d_pad]   (Wq | Wk | Wv, each zero-padded to d_pad)
    # o_ref:    [1, T, d_pad]       (lane-dense; real d_out columns sliced outside)
    x = x_ref[0].astype(jnp.bfloat16)            # [T, d_in]  bf16 MXU operand
    w_qkv = wqkv_ref[...].astype(jnp.bfloat16)   # [d_in, 3*d_pad]

    # Single fused QKV projection, f32 accumulation on the MXU.
    qkv = jnp.dot(x, w_qkv, preferred_element_type=jnp.float32)  # [T, 3*d_pad]

    q = qkv[:, :d_pad]
    k = qkv[:, d_pad:2 * d_pad]
    v = qkv[:, 2 * d_pad:]

    # Fold the softmax scale into Q (cheaper than scaling the [T, T] scores).
    q = q * scale

    # scores = q @ k.T without an explicit transpose: contract last dims.
    scores = lax.dot_general(
        q.astype(jnp.bfloat16), k.astype(jnp.bfloat16),
        dimension_numbers=(((1,), (1,)), ((), ())),
        preferred_element_type=jnp.float32,
    )                                            # [T, T], f32

    # Numerically stable softmax in f32. Exact divide (the approximate EUP
    # reciprocal broke the accuracy check last round).
    m = jnp.max(scores, axis=-1, keepdims=True)
    e = jnp.exp(scores - m)
    attn = e / jnp.sum(e, axis=-1, keepdims=True)

    # context = attn @ values  -> [T, d_pad] (padded cols stay exactly zero).
    ctx = jnp.dot(attn.astype(jnp.bfloat16), v.astype(jnp.bfloat16),
                  preferred_element_type=jnp.float32)
    o_ref[0] = ctx.astype(o_ref.dtype)


def prepare_qkv_weights(w_query, w_key, w_value, d_pad=LANE):
    """Pad each [d_in, d_out] weight to [d_in, d_pad] and fuse to [d_in, 3*d_pad].

    Do this ONCE per parameter set (hoisted out of the per-forward path)."""
    d_out = w_query.shape[1]
    pad = lambda w: jnp.pad(w, ((0, 0), (0, d_pad - d_out)))
    return jnp.concatenate([pad(w_query), pad(w_key), pad(w_value)], axis=1)


def attention_pallas(x_batched, w_qkv_padded, d_out, d_pad=LANE):
    """Batched self-attention: x_batched [B, T, d_in] -> [B, T, d_out]."""
    B, T, d_in = x_batched.shape
    scale = 1.0 / (float(d_out) ** 0.5)
    kernel = functools.partial(_attention_kernel, scale=scale, d_pad=d_pad)

    flops = B * (2 * T * d_in * 3 * d_pad    # fused QKV projection
                 + 2 * T * T * d_pad         # QK^T
                 + 2 * T * T * d_pad)        # PV
    cost = pl.CostEstimate(
        flops=flops,
        transcendentals=B * T * T,           # exp in softmax
        bytes_accessed=4 * (B * T * d_in + d_in * 3 * d_pad + B * T * d_pad))

    out_padded = pl.pallas_call(
        kernel,
        out_shape=jax.ShapeDtypeStruct((B, T, d_pad), jnp.float32),
        grid=(B,),
        in_specs=[
            pl.BlockSpec((1, T, d_in), lambda b: (b, 0, 0)),
            pl.BlockSpec((d_in, 3 * d_pad), lambda b: (0, 0)),
        ],
        out_specs=pl.BlockSpec((1, T, d_pad), lambda b: (b, 0, 0)),
        compiler_params=pltpu.CompilerParams(
            dimension_semantics=("parallel",)),
        cost_estimate=cost,
    )(x_batched, w_qkv_padded)
    return out_padded[:, :, :d_out]


def self_attention_v1(x, w_query, w_key, w_value):
    """Module-equivalent forward: x [T, d_in] -> context [T, d_out]."""
    d_out = w_query.shape[1]
    w_qkv = prepare_qkv_weights(w_query, w_key, w_value)
    return attention_pallas(x[None], w_qkv, d_out)[0]


# ----------------------------- references ----------------------------------

def _reference_f32(x, wq, wk, wv):
    q, k, v = x @ wq, x @ wk, x @ wv
    scores = q @ k.T
    w = jax.nn.softmax(scores / (k.shape[-1] ** 0.5), axis=-1)
    return w @ v


def _reference_bf16_mirror(x, wq, wk, wv):
    """Same math with the kernel's bf16 MXU-operand casts + f32 accumulation."""
    bf16, f32 = jnp.bfloat16, jnp.float32
    d_out = wq.shape[1]
    mm = lambda a, b: jnp.dot(a.astype(bf16), b.astype(bf16),
                              preferred_element_type=f32)
    q, k, v = mm(x, wq), mm(x, wk), mm(x, wv)
    q = q * (1.0 / (float(d_out) ** 0.5))
    s = mm(q, k.T)
    m = jnp.max(s, axis=-1, keepdims=True)
    e = jnp.exp(s - m)
    w = e / jnp.sum(e, axis=-1, keepdims=True)
    return mm(w, v)


if __name__ == "__main__":
    # Shapes implied by the module: T=6 tokens, d_in=3, d_out=2.
    T, d_in, d_out = 6, 3, 2

    key = jax.random.PRNGKey(0)
    kx, kq, kk, kv, kb = jax.random.split(key, 5)

    x = jax.random.uniform(kx, (T, d_in), dtype=jnp.float32)
    w_query = jax.random.uniform(kq, (d_in, d_out), dtype=jnp.float32)
    w_key = jax.random.uniform(kk, (d_in, d_out), dtype=jnp.float32)
    w_value = jax.random.uniform(kv, (d_in, d_out), dtype=jnp.float32)

    # --- single-sequence, module-equivalent call ---
    out = jax.block_until_ready(self_attention_v1(x, w_query, w_key, w_value))
    assert out.shape == (T, d_out)

    # Exact structural check against a reference with identical bf16 casts.
    mirror = _reference_bf16_mirror(x, w_query, w_key, w_value)
    assert jnp.allclose(out, mirror, atol=1e-4, rtol=1e-4)

    # Semantic check against the pure-f32 module math (tolerance covers the
    # bf16 MXU-operand rounding only).
    ref = _reference_f32(x, w_query, w_key, w_value)
    assert jnp.allclose(out, ref, atol=5e-2, rtol=5e-2)

    # --- batched call: amortizes kernel fixed cost over a 'parallel' grid ---
    B = 8
    xb = jax.random.uniform(kb, (B, T, d_in), dtype=jnp.float32)
    w_qkv = prepare_qkv_weights(w_query, w_key, w_value)   # hoisted once
    outb = jax.block_until_ready(attention_pallas(xb, w_qkv, d_out))
    assert outb.shape == (B, T, d_out)
    mirror_b = jnp.stack([_reference_bf16_mirror(xb[i], w_query, w_key, w_value)
                          for i in range(B)])
    assert jnp.allclose(outb, mirror_b, atol=1e-4, rtol=1e-4)

    print("KERNEL_OK")
</pallas_src>

<mosaic_0001>
module attributes {stable_mosaic.version = 11 : i64} {
  func.func @_attention_kernel(%arg0: i32, %arg1: memref<1x6x3xf32, #tpu.memory_space<vmem>>, %arg2: memref<3x384xf32, #tpu.memory_space<vmem>>, %arg3: memref<1x6x128xf32, #tpu.memory_space<vmem>>) attributes {dimension_semantics = [#tpu.dimension_semantics<parallel>], iteration_bounds = array<i64: 1>, scalar_prefetch = 0 : i64, scratch_operands = 0 : i64, tpu.core_type = #tpu.core_type<tc>, window_params = [{transform_indices = @transform_0, window_bounds = array<i64: 1, 6, 3>}, {pipeline_mode = #tpu.pipeline_mode<synchronous>, transform_indices = @transform_1, window_bounds = array<i64: 3, 384>}, {transform_indices = @transform_2, window_bounds = array<i64: 1, 6, 128>}]} {
    %c0 = arith.constant 0 : index
    %c0_0 = arith.constant 0 : index
    %c0_1 = arith.constant 0 : index
    %0 = vector.load %arg1[%c0, %c0_0, %c0_1] : memref<1x6x3xf32, #tpu.memory_space<vmem>>, vector<1x6x3xf32>
    %1 = vector.shape_cast %0 : vector<1x6x3xf32> to vector<6x3xf32>
    %2 = arith.truncf %1 : vector<6x3xf32> to vector<6x3xbf16>
    %c0_2 = arith.constant 0 : index
    %c0_3 = arith.constant 0 : index
    %3 = vector.load %arg2[%c0_2, %c0_3] : memref<3x384xf32, #tpu.memory_space<vmem>>, vector<3x384xf32>
    %4 = arith.truncf %3 : vector<3x384xf32> to vector<3x384xbf16>
    %cst = arith.constant dense<0.000000e+00> : vector<6x384xf32>
    %5 = tpu.matmul %2, %4, %cst {dimension_numbers = #tpu.dot_dimension_numbers<[1], [0], [0], [1], [0, 0, 1, 1], [], []>} : vector<6x3xbf16>, vector<3x384xbf16>, vector<6x384xf32> -> vector<6x384xf32>
    %6 = vector.extract_strided_slice %5 {offsets = [0, 0], sizes = [6, 128], strides = [1, 1]} : vector<6x384xf32> to vector<6x128xf32>
    %7 = vector.extract_strided_slice %5 {offsets = [0, 128], sizes = [6, 128], strides = [1, 1]} : vector<6x384xf32> to vector<6x128xf32>
    %8 = vector.extract_strided_slice %5 {offsets = [0, 256], sizes = [6, 128], strides = [1, 1]} : vector<6x384xf32> to vector<6x128xf32>
    %cst_4 = arith.constant 0.707106769 : f32
    %9 = vector.broadcast %cst_4 : f32 to vector<6x128xf32>
    %10 = arith.mulf %6, %9 : vector<6x128xf32>
    %11 = arith.truncf %10 : vector<6x128xf32> to vector<6x128xbf16>
    %12 = arith.truncf %7 : vector<6x128xf32> to vector<6x128xbf16>
    %cst_5 = arith.constant dense<0.000000e+00> : vector<6x6xf32>
    %13 = tpu.matmul %11, %12, %cst_5 {dimension_numbers = #tpu.dot_dimension_numbers<[1], [1], [0], [0], [0, 0, 1, 0], [], []>} : vector<6x128xbf16>, vector<6x128xbf16>, vector<6x6xf32> -> vector<6x6xf32>
    %cst_6 = arith.constant dense<0xFF800000> : vector<6xf32>
    %14 = vector.multi_reduction <maximumf>, %13, %cst_6 [1] : vector<6x6xf32> to vector<6xf32>
    %15 = vector.shape_cast %14 : vector<6xf32> to vector<6x1xf32>
    %16 = vector.broadcast %15 : vector<6x1xf32> to vector<6x6xf32>
    %17 = arith.subf %13, %16 : vector<6x6xf32>
    %18 = math.exp %17 : vector<6x6xf32>
    %cst_7 = arith.constant dense<0.000000e+00> : vector<6xf32>
    %19 = vector.multi_reduction <add>, %18, %cst_7 [1] : vector<6x6xf32> to vector<6xf32>
    %20 = vector.shape_cast %19 : vector<6xf32> to vector<6x1xf32>
    %21 = vector.broadcast %20 : vector<6x1xf32> to vector<6x6xf32>
    %22 = arith.divf %18, %21 : vector<6x6xf32>
    %23 = arith.truncf %22 : vector<6x6xf32> to vector<6x6xbf16>
    %24 = arith.truncf %8 : vector<6x128xf32> to vector<6x128xbf16>
    %cst_8 = arith.constant dense<0.000000e+00> : vector<6x128xf32>
    %25 = tpu.matmul %23, %24, %cst_8 {dimension_numbers = #tpu.dot_dimension_numbers<[1], [0], [0], [1], [0, 0, 1, 1], [], []>} : vector<6x6xbf16>, vector<6x128xbf16>, vector<6x128xf32> -> vector<6x128xf32>
    %c0_9 = arith.constant 0 : index
    %c0_10 = arith.constant 0 : index
    %c0_11 = arith.constant 0 : index
    %26 = vector.load %arg3[%c0_9, %c0_10, %c0_11] : memref<1x6x128xf32, #tpu.memory_space<vmem>>, vector<1x6x128xf32>
    %27 = vector.shape_cast %26 : vector<1x6x128xf32> to vector<6x128xf32>
    %28 = vector.shape_cast %25 : vector<6x128xf32> to vector<1x6x128xf32>
    tpu.vector_store %arg3[%c0_9, %c0_10, %c0_11], %28 {strides = array<i32>} : memref<1x6x128xf32, #tpu.memory_space<vmem>>, vector<1x6x128xf32>,
    return
  }
  func.func @transform_0(%arg0: i32) -> (i32, i32, i32) {
    %c0_i32 = arith.constant 0 : i32
    %c0_i32_0 = arith.constant 0 : i32
    %c0_i32_1 = arith.constant 0 : i32
    return %arg0, %c0_i32, %c0_i32_0 : i32, i32, i32
  }
  func.func @transform_1(%arg0: i32) -> (i32, i32) {
    %c0_i32 = arith.constant 0 : i32
    %c0_i32_0 = arith.constant 0 : i32
    %c0_i32_1 = arith.constant 0 : i32
    return %c0_i32, %c0_i32_0 : i32, i32
  }
  func.func @transform_2(%arg0: i32) -> (i32, i32, i32) {
    %c0_i32 = arith.constant 0 : i32
    %c0_i32_0 = arith.constant 0 : i32
    %c0_i32_1 = arith.constant 0 : i32
    return %arg0, %c0_i32, %c0_i32_0 : i32, i32, i32
  }
}

</mosaic_0001>

<bundles_post_ra>
// kernel: tpu_custom_call.1
= control target key start
LH: loop header
LB: loop body
LE: loop exit
PB: predicated region body
PF: predicated region fallthrough
CT: control target
= control target key end

     0   :  { %vm26_vm0 = vcmask 1040384   ;;  %vm27_vm1 = vcmask 1041408   ;;  %v266_v1 = vmov 65535   ;;  %v267_v3 = vmov 0   ;;  %s302_s1 = inlined_call_operand.vmem [shape: f32[3,384], index: 1, kind: input, shape index: {}]   ;;  %s303_s0 = inlined_call_operand.vmem [shape: f32[1,6,3], index: 0, kind: input, shape index: {}]   ;;  %s304_s2 = inlined_call_operand.vmem [shape: f32[1,6,128], index: 2, kind: output, shape index: {}]  }
   0x1   :  { %v14_v0 = vld [vmem:[%s302_s1] sm:$0x77]  ;;  %v28_v2 = vsel %vm26_vm0, 4294967295, %v266_v1  ;;  %71 = vmatprep.mubr.bf16.mxu0 %v267_v3  ;;  %vm22_vm2 = vcmask 23552   ;;  %v268_v12 = vmov 0.0   ;;  %vm269_vm3 = vmmov 0  }
   0x2   :  { %v17_v4 = vcombine.high %v14_v0, %v14_v0  ;;  %v29_v5 = vsel %vm27_vm1, %v28_v2, 0  ;;  %v19_v6 = vpack.c.bf16 %v14_v0, %v14_v0  ;;  %v12_v9 = vld [vmem:[%s303_s0] sm:$0x3f]  ;;  %239 = vmatprep.subr.bf16.mxu1 %v268_v12  ;;  %241 = vmatprep.mubr.msk.bf16.mxu1 %vm269_vm3, %v268_v12  ;;  %v15_v20 = vld [vmem:[%s302_s1 + $0x8] sm:$0x7]  ;;  %vm163_vm4 = vcmask 46080  }
   0x3   :  { %v13_v11 = vpack.c.bf16 %v12_v9, %v12_v9  ;;  %v21_v21 = vpack.c.bf16 %v15_v20, %v15_v20  ;;  %vm181_vm5 = vcmask 1042432   ;;  %vm177_vm6 = vcmask 48128  }
   0x4   :  { %v20_v7 = vpack.c.bf16 %v17_v4, %v17_v4  ;;  %v31_v8 = vand.u32 %v29_v5, %v19_v6 }
   0x5   :  { %v37_v22 = vand.u32 %v29_v5, %v21_v21 }
   0x6   :  { %v34_v10 = vand.u32 %v29_v5, %v20_v7 }
   0x7   :  { %240 = vmatpush3.bf16.msra.mxu1 %v37_v22 }
   0x8   :  { %39 = vmatprep.subr.bf16.mxu0 %v34_v10  ;;  %251 = vmatprep.subr.bf16.mxu1 %v268_v12 }
   0x9   :  { %40 = vmatpush1.bf16.msra.mxu0 %v31_v8 }
   0xa   :  { %245 = vmatprep.subr.bf16.mxu0 %v268_v12  ;;  %242 = vmatmul.mubr.msk.bf16.vlgmr.msra.gmra.mrb[0].mxu1 %vm22_vm2, %v13_v11 }
   0xb   :  { %253 = vmatprep.mubr.msk.bf16.mxu1 %vm269_vm3, %v268_v12 }
   0xc   :  { %230 = vmatmul.mubr.msk.bf16.vlgmr.msra.gmra.mrb[0].mxu0 %vm22_vm2, %v13_v11 }
   0xd   :  { %247 = vmatprep.mubr.msk.bf16.mxu0 %vm269_vm3, %v268_v12 }
  0xdd   :  { %v114_v33 = vpop.f32.mrb[0].mxu1 }
  0xde   :  { %v243_v34 = vpop.f32.mrb[1].mxu1  ;;  %v176_v37 = vpack.c.bf16 %v114_v33, %v114_v33 }
  0xdf   :  { %v73_v13 = vpop.f32.mrb[0].mxu0  ;;  %v117_v35 = vpop.f32.mrb[2].mxu1 }
  0xe0   :  { %v75_v14 = vpop.f32.mrb[1].mxu0  ;;  %v120_v18 = vmul.f32 0.70710677, %v73_v13  ;;  %v244_v36 = vpop.f32.mrb[3].mxu1  ;;  %v183_v38 = vsel %vm181_vm5, %v176_v37, 0 }
  0xe1   :  { %v122_v15 = vpack.c.bf16 %v75_v14, %v75_v14  ;;  %v77_v16 = vpop.f32.mrb[2].mxu0  ;;  %252 = vmatpush3.bf16.msra.mxu1 %v183_v38 }
  0xe2   :  { %v78_v17 = vpop.f32.mrb[3].mxu0  ;;  %v121_v19 = vpack.c.bf16 %v120_v18, %v120_v18 }
  0xe3   :  { %246 = vmatpush3.bf16.xpose.msra.mxu0 %v122_v15 }
  0xea   :  { %248 = vmatmul.mubr.bf16.vlgmr.msra.gmra.mrb[4].mxu0 %v121_v19 }
 0x1bd   :  { %v157_v23 = vpop.f32.mrb[4].mxu0 }
 0x1be   :  { %v249_v24 = vpop.f32.mrb[5].mxu0  ;;  %v164_v25 = vsel %vm163_vm4, %v157_v23, -inf }
 0x1bf   :  { %165 = vmax.xlane.f32.xlu0 %v164_v25  ;;  %v160_v26 = vpop.f32.mrb[6].mxu0 }
 0x1c0   :  { %v250_v27 = vpop.f32.mrb[7].mxu0 }
 0x24c   :  { %v166_v28 = vpop.xlane.xlu0 %165 }
 0x24d   :  { %v167_v29 = vsub.f32 %v157_v23, %v166_v28 }
 0x24f   :  { %v168_v30 = vmul.f32 1.442695, %v167_v29 }
 0x251   :  { %262 = vpow2.f32 %v168_v30 }
 0x25b   :  { %v263_v31 = vpop.eup %262 }
 0x25c   :  { %v170_v32 = vsel %vm163_vm4, %v263_v31, 0.0 }
 0x25d   :  { %171 = vadd.xlane.f32.xlu0 %v170_v32 }
 0x2ea   :  { %v172_v39 = vpop.xlane.xlu0 %171 }
 0x2eb   :  { %264 = vrcp.f32 %v172_v39 }
 0x2f5   :  { %v265_v40 = vpop.eup %264 }
 0x2f6   :  { %v174_v41 = vmul.f32 %v265_v40, %v263_v31 }
 0x2f8   :  { %v175_v42 = vpack.c.bf16 %v174_v41, %v174_v41 }
 0x2fa   :  { %254 = vmatmul.mubr.msk.bf16.vlgmr.msra.gmra.mrb[4].mxu1 %vm177_vm6, %v175_v42 }
 0x3cd   :  { %v219_v43 = vpop.f32.mrb[4].mxu1 }
 0x3ce   :  { %225 = vst [vmem:[%s304_s2] sm:$0x3f] %v219_v43  ;;  %v255_v44 = vpop.f32.mrb[5].mxu1 }
 0x3cf   :  { %v222_v45 = vpop.f32.mrb[6].mxu1 }
 0x3d0   :  { %v256_v46 = vpop.f32.mrb[7].mxu1 }

</bundles_post_ra>
